<compile_context>
chip_gen: v6e
topology: v6e:2x2x1
jax: 0.10.0
libtpu: 0.0.40
codegen_flags: <defaults>
</compile_context>

<pallas_src>
import functools

import jax
import jax.numpy as jnp
from jax.experimental import pallas as pl
from jax.experimental.pallas import tpu as pltpu

LANE = 128  # TPU lane width; pad the head output to a lane-dense store


# ----------------------------- Pallas kernel --------------------------------

def _make_fused_kernel(relu_flags):
    """Build the fused forward kernel for a fixed layer structure.

    relu_flags[i] is True iff a ReLU follows linear layer i.  The last linear
    is always followed by a sigmoid (the FCNSGDLN head).
    Kernel refs: (x, w0, b0, w1, b1, ..., wL, bL, out).
    """
    n_layers = len(relu_flags)

    def kernel(*refs):
        x_ref = refs[0]
        out_ref = refs[-1]
        h = x_ref[...]                          # bf16 [B, dim]
        for li in range(n_layers):
            w_ref = refs[1 + 2 * li]            # bf16 [in_i, out_i]
            b_ref = refs[2 + 2 * li]            # f32  [1, out_i]
            z = jnp.dot(h, w_ref[...], preferred_element_type=jnp.float32)
            z = z + b_ref[...]                  # broadcast over batch rows
            if relu_flags[li]:
                z = jnp.maximum(z, 0.0)
            if li < n_layers - 1:
                h = z.astype(jnp.bfloat16)      # feed the MXU bf16 again
            else:
                # head: sigmoid, lane-dense [B, LANE] store (unmasked vst)
                out_ref[...] = 1.0 / (1.0 + jnp.exp(-z))

    return kernel


@functools.partial(jax.jit, static_argnames=("relu_flags",))
def fcnsgdln_forward(x, weights, biases, relu_flags):
    """Fused FCNSGDLN forward: sigmoid(last_layer(initial_layers(x))).

    x:       [B, dimension] f32
    weights: tuple of [in_i, out_i] matrices (head zero-padded to LANE cols)
    biases:  tuple of [1, out_i] vectors (head zero-padded to LANE cols)
    Dropout layers of the PyTorch module are inference-mode identities here.
    Returns [B, 1] f32.
    """
    B = x.shape[0]
    kernel = _make_fused_kernel(relu_flags)

    operands = [x.astype(jnp.bfloat16)]
    for w, b in zip(weights, biases):
        operands.append(w.astype(jnp.bfloat16))
        operands.append(b.astype(jnp.float32))

    out_padded = pl.pallas_call(
        kernel,
        out_shape=jax.ShapeDtypeStruct((B, LANE), jnp.float32),
        in_specs=[pl.BlockSpec(memory_space=pltpu.MemorySpace.VMEM)] * len(operands),
        out_specs=pl.BlockSpec(memory_space=pltpu.MemorySpace.VMEM),
    )(*operands)
    return out_padded[:, :1]


# ------------------------ Parameter / structure setup ------------------------

def fcnsgdln_layer_structure(dimension, num_layers, hidden_size,
                             num_linear_layers):
    """(in_dim, out_dim, relu_after) for every Linear of the module, in order."""
    dims = []
    for i in range(num_layers - 1):
        in_dim = dimension if i == 0 else hidden_size
        block = [(in_dim, hidden_size, False)]
        for _ in range(num_linear_layers):
            block.append((hidden_size, hidden_size, False))
        last_in, last_out, _ = block[-1]
        block[-1] = (last_in, last_out, True)   # ReLU after the block's last Linear
        dims.extend(block)
    dims.append((hidden_size, 1, False))        # last_layer (sigmoid in kernel)
    return dims


def init_fcnsgdln_params(key, layer_dims):
    """PyTorch nn.Linear-style init; W stored as [in, out] for x @ W."""
    weights, biases = [], []
    for (in_dim, out_dim, _) in layer_dims:
        key, kw, kb = jax.random.split(key, 3)
        bound = 1.0 / (in_dim ** 0.5)
        w = jax.random.uniform(kw, (in_dim, out_dim), jnp.float32, -bound, bound)
        b = jax.random.uniform(kb, (1, out_dim), jnp.float32, -bound, bound)
        weights.append(w)
        biases.append(b)
    # Lane-dense head: zero-pad the hidden->1 layer out to LANE columns so the
    # kernel's only HBM store is a full-vreg unmasked store (wrapper slices [:, :1]).
    weights[-1] = jnp.pad(weights[-1], ((0, 0), (0, LANE - weights[-1].shape[1])))
    biases[-1] = jnp.pad(biases[-1], ((0, 0), (0, LANE - biases[-1].shape[1])))
    return tuple(weights), tuple(biases)


# ------------------------------ Reference ------------------------------------

def fcnsgdln_reference(x, weights, biases, relu_flags):
    """Plain-JAX reference with the same bf16/f32 mixed precision."""
    h = x.astype(jnp.bfloat16)
    n = len(relu_flags)
    out = None
    for li, (w, b) in enumerate(zip(weights, biases)):
        z = jnp.dot(h, w.astype(jnp.bfloat16),
                    preferred_element_type=jnp.float32) + b.astype(jnp.float32)
        if relu_flags[li]:
            z = jnp.maximum(z, 0.0)
        if li < n - 1:
            h = z.astype(jnp.bfloat16)
        else:
            out = 1.0 / (1.0 + jnp.exp(-z))
    return out[:, :1]


# ---------------------------------- Main --------------------------------------

if __name__ == "__main__":
    # Small shapes consistent with the module.
    B = 8
    dimension = 32
    num_layers = 3
    hidden_size = 32
    num_linear_layers = 2
    dropout = 0.0  # add_dropout=False
    # TODO(synk): training-mode nn.Dropout (stochastic masking via pltpu.prng_*)
    # is not implemented; this forward is eval-mode (dropout = identity).

    layer_dims = fcnsgdln_layer_structure(dimension, num_layers, hidden_size,
                                          num_linear_layers)
    relu_flags = tuple(r for (_, _, r) in layer_dims)

    key = jax.random.PRNGKey(0)
    k_params, k_x = jax.random.split(key)
    weights, biases = init_fcnsgdln_params(k_params, layer_dims)
    x = jax.random.normal(k_x, (B, dimension), dtype=jnp.float32)

    out = fcnsgdln_forward(x, weights, biases, relu_flags=relu_flags)
    out = jax.block_until_ready(out)

    assert out.shape == (B, 1)
    assert bool(jnp.all(jnp.isfinite(out)))
    assert bool(jnp.all((out >= 0.0) & (out <= 1.0)))  # sigmoid range
    ref = fcnsgdln_reference(x, weights, biases, relu_flags)
    assert bool(jnp.allclose(out, ref, atol=1e-3)), (out, ref)

    print("KERNEL_OK")
</pallas_src>

<mosaic_0001>
module attributes {stable_mosaic.version = 11 : i64} {
  func.func @kernel(%arg0: memref<8x32xbf16, #tpu.memory_space<vmem>>, %arg1: memref<32x32xbf16, #tpu.memory_space<vmem>>, %arg2: memref<1x32xf32, #tpu.memory_space<vmem>>, %arg3: memref<32x32xbf16, #tpu.memory_space<vmem>>, %arg4: memref<1x32xf32, #tpu.memory_space<vmem>>, %arg5: memref<32x32xbf16, #tpu.memory_space<vmem>>, %arg6: memref<1x32xf32, #tpu.memory_space<vmem>>, %arg7: memref<32x32xbf16, #tpu.memory_space<vmem>>, %arg8: memref<1x32xf32, #tpu.memory_space<vmem>>, %arg9: memref<32x32xbf16, #tpu.memory_space<vmem>>, %arg10: memref<1x32xf32, #tpu.memory_space<vmem>>, %arg11: memref<32x32xbf16, #tpu.memory_space<vmem>>, %arg12: memref<1x32xf32, #tpu.memory_space<vmem>>, %arg13: memref<32x128xbf16, #tpu.memory_space<vmem>>, %arg14: memref<1x128xf32, #tpu.memory_space<vmem>>, %arg15: memref<8x128xf32, #tpu.memory_space<vmem>>) attributes {dimension_semantics = [], scalar_prefetch = 0 : i64, scratch_operands = 0 : i64, tpu.core_type = #tpu.core_type<tc>} {
    %c0 = arith.constant 0 : index
    %c0_0 = arith.constant 0 : index
    %0 = vector.load %arg0[%c0, %c0_0] : memref<8x32xbf16, #tpu.memory_space<vmem>>, vector<8x32xbf16>
    %c0_1 = arith.constant 0 : index
    %c0_2 = arith.constant 0 : index
    %1 = vector.load %arg1[%c0_1, %c0_2] : memref<32x32xbf16, #tpu.memory_space<vmem>>, vector<32x32xbf16>
    %cst = arith.constant dense<0.000000e+00> : vector<8x32xf32>
    %2 = tpu.matmul %0, %1, %cst {dimension_numbers = #tpu.dot_dimension_numbers<[1], [0], [0], [1], [0, 0, 1, 1], [], []>} : vector<8x32xbf16>, vector<32x32xbf16>, vector<8x32xf32> -> vector<8x32xf32>
    %c0_3 = arith.constant 0 : index
    %c0_4 = arith.constant 0 : index
    %3 = vector.load %arg2[%c0_3, %c0_4] : memref<1x32xf32, #tpu.memory_space<vmem>>, vector<1x32xf32>
    %4 = vector.broadcast %3 : vector<1x32xf32> to vector<8x32xf32>
    %5 = arith.addf %2, %4 : vector<8x32xf32>
    %6 = arith.truncf %5 : vector<8x32xf32> to vector<8x32xbf16>
    %c0_5 = arith.constant 0 : index
    %c0_6 = arith.constant 0 : index
    %7 = vector.load %arg3[%c0_5, %c0_6] : memref<32x32xbf16, #tpu.memory_space<vmem>>, vector<32x32xbf16>
    %cst_7 = arith.constant dense<0.000000e+00> : vector<8x32xf32>
    %8 = tpu.matmul %6, %7, %cst_7 {dimension_numbers = #tpu.dot_dimension_numbers<[1], [0], [0], [1], [0, 0, 1, 1], [], []>} : vector<8x32xbf16>, vector<32x32xbf16>, vector<8x32xf32> -> vector<8x32xf32>
    %c0_8 = arith.constant 0 : index
    %c0_9 = arith.constant 0 : index
    %9 = vector.load %arg4[%c0_8, %c0_9] : memref<1x32xf32, #tpu.memory_space<vmem>>, vector<1x32xf32>
    %10 = vector.broadcast %9 : vector<1x32xf32> to vector<8x32xf32>
    %11 = arith.addf %8, %10 : vector<8x32xf32>
    %12 = arith.truncf %11 : vector<8x32xf32> to vector<8x32xbf16>
    %c0_10 = arith.constant 0 : index
    %c0_11 = arith.constant 0 : index
    %13 = vector.load %arg5[%c0_10, %c0_11] : memref<32x32xbf16, #tpu.memory_space<vmem>>, vector<32x32xbf16>
    %cst_12 = arith.constant dense<0.000000e+00> : vector<8x32xf32>
    %14 = tpu.matmul %12, %13, %cst_12 {dimension_numbers = #tpu.dot_dimension_numbers<[1], [0], [0], [1], [0, 0, 1, 1], [], []>} : vector<8x32xbf16>, vector<32x32xbf16>, vector<8x32xf32> -> vector<8x32xf32>
    %c0_13 = arith.constant 0 : index
    %c0_14 = arith.constant 0 : index
    %15 = vector.load %arg6[%c0_13, %c0_14] : memref<1x32xf32, #tpu.memory_space<vmem>>, vector<1x32xf32>
    %16 = vector.broadcast %15 : vector<1x32xf32> to vector<8x32xf32>
    %17 = arith.addf %14, %16 : vector<8x32xf32>
    %cst_15 = arith.constant 0.000000e+00 : f32
    %18 = vector.broadcast %cst_15 : f32 to vector<8x32xf32>
    %19 = arith.maximumf %17, %18 : vector<8x32xf32>
    %20 = arith.truncf %19 : vector<8x32xf32> to vector<8x32xbf16>
    %c0_16 = arith.constant 0 : index
    %c0_17 = arith.constant 0 : index
    %21 = vector.load %arg7[%c0_16, %c0_17] : memref<32x32xbf16, #tpu.memory_space<vmem>>, vector<32x32xbf16>
    %cst_18 = arith.constant dense<0.000000e+00> : vector<8x32xf32>
    %22 = tpu.matmul %20, %21, %cst_18 {dimension_numbers = #tpu.dot_dimension_numbers<[1], [0], [0], [1], [0, 0, 1, 1], [], []>} : vector<8x32xbf16>, vector<32x32xbf16>, vector<8x32xf32> -> vector<8x32xf32>
    %c0_19 = arith.constant 0 : index
    %c0_20 = arith.constant 0 : index
    %23 = vector.load %arg8[%c0_19, %c0_20] : memref<1x32xf32, #tpu.memory_space<vmem>>, vector<1x32xf32>
    %24 = vector.broadcast %23 : vector<1x32xf32> to vector<8x32xf32>
    %25 = arith.addf %22, %24 : vector<8x32xf32>
    %26 = arith.truncf %25 : vector<8x32xf32> to vector<8x32xbf16>
    %c0_21 = arith.constant 0 : index
    %c0_22 = arith.constant 0 : index
    %27 = vector.load %arg9[%c0_21, %c0_22] : memref<32x32xbf16, #tpu.memory_space<vmem>>, vector<32x32xbf16>
    %cst_23 = arith.constant dense<0.000000e+00> : vector<8x32xf32>
    %28 = tpu.matmul %26, %27, %cst_23 {dimension_numbers = #tpu.dot_dimension_numbers<[1], [0], [0], [1], [0, 0, 1, 1], [], []>} : vector<8x32xbf16>, vector<32x32xbf16>, vector<8x32xf32> -> vector<8x32xf32>
    %c0_24 = arith.constant 0 : index
    %c0_25 = arith.constant 0 : index
    %29 = vector.load %arg10[%c0_24, %c0_25] : memref<1x32xf32, #tpu.memory_space<vmem>>, vector<1x32xf32>
    %30 = vector.broadcast %29 : vector<1x32xf32> to vector<8x32xf32>
    %31 = arith.addf %28, %30 : vector<8x32xf32>
    %32 = arith.truncf %31 : vector<8x32xf32> to vector<8x32xbf16>
    %c0_26 = arith.constant 0 : index
    %c0_27 = arith.constant 0 : index
    %33 = vector.load %arg11[%c0_26, %c0_27] : memref<32x32xbf16, #tpu.memory_space<vmem>>, vector<32x32xbf16>
    %cst_28 = arith.constant dense<0.000000e+00> : vector<8x32xf32>
    %34 = tpu.matmul %32, %33, %cst_28 {dimension_numbers = #tpu.dot_dimension_numbers<[1], [0], [0], [1], [0, 0, 1, 1], [], []>} : vector<8x32xbf16>, vector<32x32xbf16>, vector<8x32xf32> -> vector<8x32xf32>
    %c0_29 = arith.constant 0 : index
    %c0_30 = arith.constant 0 : index
    %35 = vector.load %arg12[%c0_29, %c0_30] : memref<1x32xf32, #tpu.memory_space<vmem>>, vector<1x32xf32>
    %36 = vector.broadcast %35 : vector<1x32xf32> to vector<8x32xf32>
    %37 = arith.addf %34, %36 : vector<8x32xf32>
    %cst_31 = arith.constant 0.000000e+00 : f32
    %38 = vector.broadcast %cst_31 : f32 to vector<8x32xf32>
    %39 = arith.maximumf %37, %38 : vector<8x32xf32>
    %40 = arith.truncf %39 : vector<8x32xf32> to vector<8x32xbf16>
    %c0_32 = arith.constant 0 : index
    %c0_33 = arith.constant 0 : index
    %41 = vector.load %arg13[%c0_32, %c0_33] : memref<32x128xbf16, #tpu.memory_space<vmem>>, vector<32x128xbf16>
    %cst_34 = arith.constant dense<0.000000e+00> : vector<8x128xf32>
    %42 = tpu.matmul %40, %41, %cst_34 {dimension_numbers = #tpu.dot_dimension_numbers<[1], [0], [0], [1], [0, 0, 1, 1], [], []>} : vector<8x32xbf16>, vector<32x128xbf16>, vector<8x128xf32> -> vector<8x128xf32>
    %c0_35 = arith.constant 0 : index
    %c0_36 = arith.constant 0 : index
    %43 = vector.load %arg14[%c0_35, %c0_36] : memref<1x128xf32, #tpu.memory_space<vmem>>, vector<1x128xf32>
    %44 = vector.broadcast %43 : vector<1x128xf32> to vector<8x128xf32>
    %45 = arith.addf %42, %44 : vector<8x128xf32>
    %cst_37 = arith.constant 0.000000e+00 : f32
    %46 = vector.broadcast %cst_37 : f32 to vector<8x128xf32>
    %47 = arith.subf %46, %45 : vector<8x128xf32>
    %48 = math.exp %47 : vector<8x128xf32>
    %cst_38 = arith.constant 1.000000e+00 : f32
    %49 = vector.broadcast %cst_38 : f32 to vector<8x128xf32>
    %50 = arith.addf %49, %48 : vector<8x128xf32>
    %cst_39 = arith.constant 1.000000e+00 : f32
    %51 = vector.broadcast %cst_39 : f32 to vector<8x128xf32>
    %52 = arith.divf %51, %50 : vector<8x128xf32>
    %c0_40 = arith.constant 0 : index
    %c0_41 = arith.constant 0 : index
    %53 = vector.load %arg15[%c0_40, %c0_41] : memref<8x128xf32, #tpu.memory_space<vmem>>, vector<8x128xf32>
    tpu.vector_store %arg15[%c0_40, %c0_41], %52 {strides = array<i32>} : memref<8x128xf32, #tpu.memory_space<vmem>>, vector<8x128xf32>,
    return
  }
}

</mosaic_0001>

<bundles_post_ra>
// kernel: fcnsgdln_forward.1
= control target key start
LH: loop header
LB: loop body
LE: loop exit
PB: predicated region body
PF: predicated region fallthrough
CT: control target
= control target key end

     0   :  { %v659_v0 = vmov 0.0   ;;  %vm660_vm0 = vmmov 0   ;;  %vm75_vm1 = vcmask 261120   ;;  %s845_s1 = inlined_call_operand.vmem [shape: bf16[32,32], index: 1, kind: input, shape index: {}]   ;;  %s846_s3 = inlined_call_operand.vmem [shape: bf16[32,32], index: 3, kind: input, shape index: {}]   ;;  %s847_s0 = inlined_call_operand.vmem [shape: bf16[8,32], index: 0, kind: input, shape index: {}]   ;;  %s848_s5 = inlined_call_operand.vmem [shape: bf16[32,32], index: 5, kind: input, shape index: {}]   ;;  %s849_s2 = inlined_call_operand.vmem [shape: f32[1,32], index: 2, kind: input, shape index: {}]   ;;  %s850_s7 = inlined_call_operand.vmem [shape: bf16[32,32], index: 7, kind: input, shape index: {}]   ;;  %s851_s4 = inlined_call_operand.vmem [shape: f32[1,32], index: 4, kind: input, shape index: {}]   ;;  %s852_s9 = inlined_call_operand.vmem [shape: bf16[32,32], index: 9, kind: input, shape index: {}]   ;;  %s853_s6 = inlined_call_operand.vmem [shape: f32[1,32], index: 6, kind: input, shape index: {}]   ;;  %s854_s11 = inlined_call_operand.vmem [shape: bf16[32,32], index: 11, kind: input, shape index: {}]   ;;  %s855_s8 = inlined_call_operand.vmem [shape: f32[1,32], index: 8, kind: input, shape index: {}]   ;;  %s856_s13 = inlined_call_operand.vmem [shape: bf16[32,128], index: 13, kind: input, shape index: {}]   ;;  %s857_s10 = inlined_call_operand.vmem [shape: f32[1,32], index: 10, kind: input, shape index: {}]   ;;  %s858_s12 = inlined_call_operand.vmem [shape: f32[1,32], index: 12, kind: input, shape index: {}]   ;;  %s859_s14 = inlined_call_operand.vmem [shape: f32[1,128], index: 14, kind: input, shape index: {}]   ;;  %s860_s15 = inlined_call_operand.vmem [shape: f32[8,128], index: 15, kind: output, shape index: {}]  }
   0x1   :  { %583 = vmatprep.subr.bf16.mxu0 %v659_v0  ;;  %v641_v1 = vld [vmem:[%s845_s1 + $0x8] sm:$0xff]   ;;  %587 = vmatprep.mubr.msk.bf16.mxu0 %vm660_vm0, %v659_v0  ;;  %v642_v2 = vld [vmem:[%s845_s1] sm:$0xff]  }
   0x2   :  { %591 = vmatprep.subr.bf16.mxu1 %v659_v0  ;;  %595 = vmatprep.mubr.msk.bf16.mxu1 %vm660_vm0, %v659_v0  ;;  %v643_v3 = vld [vmem:[%s846_s3 + $0x8] sm:$0xff]   ;;  %v51_v4 = vld [vmem:[%s847_s0] sm:$0xf] }
   0x3   :  { %584 = vmatpush3.bf16.msra.mxu0 %v641_v1  ;;  %592 = vmatpush3.bf16.msra.mxu1 %v643_v3  ;;  %v644_v5 = vld [vmem:[%s846_s3] sm:$0xff]   ;;  %v645_v6 = vld [vmem:[%s848_s5 + $0x8] sm:$0xff]  }
   0x4   :  { %585 = vmatprep.subr.bf16.mxu0 %v659_v0  ;;  %593 = vmatprep.subr.bf16.mxu1 %v659_v0  ;;  %v534_v7 = vld [vmem:[%s849_s2] ss:$0 sm:$0xff]  ;;  %v647_v15 = vld [vmem:[%s850_s7 + $0x8] sm:$0xff]  }
   0x5   :  { %v646_v14 = vld [vmem:[%s848_s5] sm:$0xff]   ;;  %v649_v24 = vld [vmem:[%s852_s9 + $0x8] sm:$0xff]  }
   0x6   :  { %v538_v16 = vld [vmem:[%s851_s4] ss:$0 sm:$0xff]  ;;  %v651_v34 = vld [vmem:[%s854_s11 + $0x8] sm:$0xff]  }
   0x7   :  { %586 = vmatpush3.bf16.msra.mxu0 %v642_v2  ;;  %594 = vmatpush3.bf16.msra.mxu1 %v644_v5  ;;  %v648_v23 = vld [vmem:[%s850_s7] sm:$0xff]   ;;  %v653_v43 = vld [vmem:[%s856_s13 + $0x8] sm:$0xff]  }
   0x8   :  { %599 = vmatprep.subr.bf16.mxu0 %v659_v0  ;;  %607 = vmatprep.subr.bf16.mxu1 %v659_v0  ;;  %v542_v25 = vld [vmem:[%s853_s6] ss:$0 sm:$0xff] }
   0x9   :  { %v650_v33 = vld [vmem:[%s852_s9] sm:$0xff]  }
   0xa   :  { %588 = vmatmul.mubr.msk.bf16.vlgmr.msra.gmra.mxu0 %vm75_vm1, %v51_v4  ;;  %v546_v35 = vld [vmem:[%s855_s8] ss:$0 sm:$0xff] }
   0xb   :  { %603 = vmatprep.mubr.msk.bf16.mxu0 %vm660_vm0, %v659_v0  ;;  %600 = vmatpush3.bf16.msra.mxu0 %v645_v6  ;;  %v652_v42 = vld [vmem:[%s854_s11] sm:$0xff]  }
   0xc   :  { %601 = vmatprep.subr.bf16.mxu0 %v659_v0  ;;  %v550_v44 = vld [vmem:[%s857_s10] ss:$0 sm:$0xff] }
   0xd   :  { %v654_v51 = vld [vmem:[%s856_s13] sm:$0xff]  }
   0xe   :  { %v554_v52 = vld [vmem:[%s858_s12] ss:$0 sm:$0xff] }
   0xf   :  { %602 = vmatpush3.bf16.msra.mxu0 %v646_v14  ;;  %v558_v60 = vld [vmem:[%s859_s14] ss:$0 sm:$0xff] }
  0x10   :  { %615 = vmatprep.subr.bf16.mxu0 %v659_v0 }
  0xca   :  { %v113_v8 = vpop.f32.mrf.mxu0 }
  0xcb   :  { %v114_v9 = vadd.f32 %v534_v7, %v113_v8 }
  0xcc   :  { %v589_v10 = vpop.f32.mrf.mxu0 }
  0xcd   :  { %v119_v11 = vpack.c.bf16 %v114_v9, %v114_v9 }
  0xce   :  { %v116_v12 = vpop.f32.mrf.mxu0 }
  0xcf   :  { %596 = vmatmul.mubr.msk.bf16.vlgmr.msra.gmra.mxu1 %vm75_vm1, %v119_v11 }
  0xd0   :  { %v590_v13 = vpop.f32.mrf.mxu0  ;;  %611 = vmatprep.mubr.msk.bf16.mxu1 %vm660_vm0, %v659_v0  ;;  %608 = vmatpush3.bf16.msra.mxu1 %v647_v15 }
  0xd1   :  { %609 = vmatprep.subr.bf16.mxu1 %v659_v0 }
  0xd4   :  { %610 = vmatpush3.bf16.msra.mxu1 %v648_v23 }
  0xd5   :  { %623 = vmatprep.subr.bf16.mxu1 %v659_v0 }
 0x18f   :  { %v180_v17 = vpop.f32.mrf.mxu1 }
 0x190   :  { %v181_v18 = vadd.f32 %v538_v16, %v180_v17 }
 0x191   :  { %v597_v19 = vpop.f32.mrf.mxu1 }
 0x192   :  { %v186_v20 = vpack.c.bf16 %v181_v18, %v181_v18 }
 0x193   :  { %v183_v21 = vpop.f32.mrf.mxu1 }
 0x194   :  { %604 = vmatmul.mubr.msk.bf16.vlgmr.msra.gmra.mxu0 %vm75_vm1, %v186_v20 }
 0x195   :  { %v598_v22 = vpop.f32.mrf.mxu1  ;;  %619 = vmatprep.mubr.msk.bf16.mxu0 %vm660_vm0, %v659_v0  ;;  %616 = vmatpush3.bf16.msra.mxu0 %v649_v24 }
 0x196   :  { %617 = vmatprep.subr.bf16.mxu0 %v659_v0 }
 0x199   :  { %618 = vmatpush3.bf16.msra.mxu0 %v650_v33 }
 0x19a   :  { %631 = vmatprep.subr.bf16.mxu0 %v659_v0 }
 0x254   :  { %v247_v26 = vpop.f32.mrf.mxu0 }
 0x255   :  { %v248_v27 = vadd.f32 %v542_v25, %v247_v26 }
 0x256   :  { %v605_v28 = vpop.f32.mrf.mxu0 }
 0x257   :  { %v253_v29 = vmax.f32 %v248_v27, 0.0 }
 0x258   :  { %v250_v30 = vpop.f32.mrf.mxu0 }
 0x259   :  { %v254_v31 = vpack.c.bf16 %v253_v29, %v253_v29 }
 0x25a   :  { %v606_v32 = vpop.f32.mrf.mxu0 }
 0x25b   :  { %612 = vmatmul.mubr.msk.bf16.vlgmr.msra.gmra.mxu1 %vm75_vm1, %v254_v31 }
 0x25c   :  { %627 = vmatprep.mubr.msk.bf16.mxu1 %vm660_vm0, %v659_v0  ;;  %624 = vmatpush3.bf16.msra.mxu1 %v651_v34 }
 0x25d   :  { %625 = vmatprep.subr.bf16.mxu1 %v659_v0 }
 0x260   :  { %626 = vmatpush3.bf16.msra.mxu1 %v652_v42 }
 0x31b   :  { %v315_v36 = vpop.f32.mrf.mxu1 }
 0x31c   :  { %v316_v37 = vadd.f32 %v546_v35, %v315_v36 }
 0x31d   :  { %v613_v38 = vpop.f32.mrf.mxu1 }
 0x31e   :  { %v321_v39 = vpack.c.bf16 %v316_v37, %v316_v37 }
 0x31f   :  { %v318_v40 = vpop.f32.mrf.mxu1 }
 0x320   :  { %620 = vmatmul.mubr.msk.bf16.vlgmr.msra.gmra.mxu0 %vm75_vm1, %v321_v39 }
 0x321   :  { %v614_v41 = vpop.f32.mrf.mxu1  ;;  %635 = vmatprep.mubr.msk.bf16.mxu0 %vm660_vm0, %v659_v0  ;;  %632 = vmatpush3.bf16.msra.mxu0 %v653_v43 }
 0x322   :  { %633 = vmatprep.subr.bf16.mxu0 %v659_v0 }
 0x325   :  { %634 = vmatpush3.bf16.msra.mxu0 %v654_v51 }
 0x3e0   :  { %v382_v45 = vpop.f32.mrf.mxu0 }
 0x3e1   :  { %v383_v46 = vadd.f32 %v550_v44, %v382_v45 }
 0x3e2   :  { %v621_v47 = vpop.f32.mrf.mxu0 }
 0x3e3   :  { %v388_v48 = vpack.c.bf16 %v383_v46, %v383_v46 }
 0x3e4   :  { %v385_v49 = vpop.f32.mrf.mxu0 }
 0x3e5   :  { %628 = vmatmul.mubr.msk.bf16.vlgmr.msra.gmra.mxu1 %vm75_vm1, %v388_v48 }
 0x3e6   :  { %v622_v50 = vpop.f32.mrf.mxu0 }
 0x4a5   :  { %v449_v53 = vpop.f32.mrf.mxu1 }
 0x4a6   :  { %v450_v54 = vadd.f32 %v554_v52, %v449_v53 }
 0x4a7   :  { %v629_v55 = vpop.f32.mrf.mxu1 }
 0x4a8   :  { %v455_v56 = vmax.f32 %v450_v54, 0.0 }
 0x4a9   :  { %v452_v57 = vpop.f32.mrf.mxu1 }
 0x4aa   :  { %v456_v58 = vpack.c.bf16 %v455_v56, %v455_v56 }
 0x4ab   :  { %v630_v59 = vpop.f32.mrf.mxu1 }
 0x4ac   :  { %636 = vmatmul.mubr.msk.bf16.vlgmr.msra.gmra.mxu0 %vm75_vm1, %v456_v58 }
 0x56c   :  { %v517_v61 = vpop.f32.mrf.mxu0 }
 0x56d   :  { %v518_v62 = vadd.f32 %v558_v60, %v517_v61 }
 0x56e   :  { %v637_v63 = vpop.f32.mrf.mxu0 }
 0x56f   :  { %v523_v0 = vsub.f32 0.0, %v518_v62 }
 0x570   :  { %v520_v1 = vpop.f32.mrf.mxu0 }
 0x571   :  { %v524_v2 = vmul.f32 1.442695, %v523_v0 }
 0x572   :  { %v638_v3 = vpop.f32.mrf.mxu0 }
 0x573   :  { %655 = vpow2.f32 %v524_v2 }
 0x580   :  { %v656_v4 = vpop.eup %655 }
 0x581   :  { %v526_v5 = vadd.f32 1.0, %v656_v4 }
 0x583   :  { %657 = vrcp.f32 %v526_v5 }
 0x590   :  { %v658_v6 = vpop.eup %657 }
 0x591   :  { %529 = vst [vmem:[%s860_s15] sm:$0xff] %v658_v6 }

</bundles_post_ra>
